<compile_context>
chip_gen: v6e
topology: v6e:2x2x1
jax: 0.10.0
libtpu: 0.0.40
codegen_flags: <defaults>
</compile_context>

<pallas_src>
import jax
import jax.numpy as jnp
from jax.experimental import pallas as pl
from jax.experimental.pallas import tpu as pltpu


def dqn_kernel(xT_ref, w1_ref, b1_ref, w2_ref, b2_ref, out_ref):
    # xT_ref : [n_states,  TILE_B]   feature-major input tile (lanes = batch)
    # w1_ref : [n_neurons, n_states] resident (PyTorch layout, natural LHS)
    # b1_ref : [n_neurons, 1]
    # w2_ref : [n_actions, n_neurons]
    # b2_ref : [n_actions, 1]
    # out_ref: [n_actions, TILE_B]   lane-dense output tile
    xT = xT_ref[...]

    # fc1 -> ReLU   (MXU: [32,8] @ [8,TILE_B])
    h = jnp.dot(w1_ref[...], xT, preferred_element_type=jnp.float32) + b1_ref[...]
    h = jnp.maximum(h, 0.0)

    # out layer     (MXU: [4,32] @ [32,TILE_B])
    logits = jnp.dot(w2_ref[...], h, preferred_element_type=jnp.float32) + b2_ref[...]

    # Numerically-stable softmax over the actions axis (axis 0: 4 sublanes).
    m = jnp.max(logits, axis=0, keepdims=True)
    e = jnp.exp(logits - m)
    denom = jnp.sum(e, axis=0, keepdims=True)
    out_ref[...] = (e / denom).astype(out_ref.dtype)   # exact divide (mem-bound)


def simple_dqn_forward(x, w1, b1, w2, b2, tile_b=2048):
    """x: [B, n_states] (f32 or bf16). Returns softmax action values [B, n_actions].

    w1: [n_neurons, n_states], b1: [n_neurons]
    w2: [n_actions, n_neurons], b2: [n_actions]   (PyTorch Linear layout)
    """
    B, n_states = x.shape
    n_neurons = w1.shape[0]
    n_actions = w2.shape[0]

    if x.dtype not in (jnp.bfloat16, jnp.float32):
        x = x.astype(jnp.float32)

    # Batch tile along the lane axis: multiple of 128, no larger than needed.
    tile_b = max(128, (min(int(tile_b), pl.cdiv(B, 128) * 128) // 128) * 128)
    # v7x has 2 TensorCores: keep >= 2 "parallel" grid steps when batch allows.
    if B > 128 and pl.cdiv(B, tile_b) < 2:
        tile_b = pl.cdiv(pl.cdiv(B, 2), 128) * 128
    b_pad = pl.cdiv(B, tile_b) * tile_b
    grid = (b_pad // tile_b,)

    # Feature-major input. Pad + transpose fuse into a single XLA copy; this is
    # the only extra HBM pass over x.  Padded columns are zeros -> bias-only
    # softmax in those columns, sliced off below, never read by the caller.
    # TODO(synk): if the producer can supply x already as [n_states, B], pass it
    # straight through and drop this transpose entirely.
    xT = jnp.pad(x, ((0, b_pad - B), (0, 0))).T            # [n_states, b_pad]

    w1f = jnp.asarray(w1, jnp.float32)                      # [n_neurons, n_states]
    w2f = jnp.asarray(w2, jnp.float32)                      # [n_actions, n_neurons]
    b1c = jnp.asarray(b1, jnp.float32).reshape(n_neurons, 1)
    b2c = jnp.asarray(b2, jnp.float32).reshape(n_actions, 1)

    out_t = pl.pallas_call(
        dqn_kernel,
        out_shape=jax.ShapeDtypeStruct((n_actions, b_pad), jnp.float32),
        grid=grid,
        in_specs=[
            # streamed per batch tile (double-buffered HBM->VMEM DMA)
            pl.BlockSpec((n_states, tile_b), lambda i: (0, i)),
            # weights / biases: same block every step -> VMEM-resident
            pl.BlockSpec((n_neurons, n_states), lambda i: (0, 0)),
            pl.BlockSpec((n_neurons, 1), lambda i: (0, 0)),
            pl.BlockSpec((n_actions, n_neurons), lambda i: (0, 0)),
            pl.BlockSpec((n_actions, 1), lambda i: (0, 0)),
        ],
        out_specs=pl.BlockSpec((n_actions, tile_b), lambda i: (0, i)),
        compiler_params=pltpu.CompilerParams(
            dimension_semantics=("parallel",)),
    )(xT, w1f, b1c, w2f, b2c)

    # Back to the module's [B, n_actions] layout; drop padded columns.
    return out_t[:, :B].T


def init_params(key, n_states, n_actions, n_neurons=32):
    """Deterministic params matching the module: weights ~ N(0, 0.1), biases
    small uniform (PyTorch Linear default bias range 1/sqrt(fan_in))."""
    k1, k2, k3, k4 = jax.random.split(key, 4)
    w1 = 0.1 * jax.random.normal(k1, (n_neurons, n_states), dtype=jnp.float32)
    b1_bound = 1.0 / jnp.sqrt(n_states)
    b1 = jax.random.uniform(k2, (n_neurons,), minval=-b1_bound, maxval=b1_bound,
                            dtype=jnp.float32)
    w2 = 0.1 * jax.random.normal(k3, (n_actions, n_neurons), dtype=jnp.float32)
    b2_bound = 1.0 / jnp.sqrt(n_neurons)
    b2 = jax.random.uniform(k4, (n_actions,), minval=-b2_bound, maxval=b2_bound,
                            dtype=jnp.float32)
    return w1, b1, w2, b2


def _reference(x, w1, b1, w2, b2):
    h = jnp.maximum(x @ w1.T + b1, 0.0)
    return jax.nn.softmax(h @ w2.T + b2, axis=1)


if __name__ == "__main__":
    key = jax.random.PRNGKey(0)
    k_params, k_x1, k_x2, k_x3 = jax.random.split(key, 4)

    n_states, n_actions, n_neurons = 8, 4, 32
    w1, b1, w2, b2 = init_params(k_params, n_states, n_actions, n_neurons)

    # Case 1: tiny batch (single 128-lane tile, grid=(1,)).
    B1 = 2
    x1 = jax.random.normal(k_x1, (B1, n_states), dtype=jnp.float32)
    out1 = jax.block_until_ready(simple_dqn_forward(x1, w1, b1, w2, b2))
    ref1 = _reference(x1, w1, b1, w2, b2)
    assert out1.shape == (B1, n_actions)
    assert jnp.allclose(out1, ref1, atol=1e-5, rtol=1e-5)
    assert jnp.allclose(jnp.sum(out1, axis=1), 1.0, atol=1e-5)

    # Case 2: multi-tile grid with a ragged tail (exercises pipelining + padding).
    B2 = 300
    x2 = jax.random.normal(k_x2, (B2, n_states), dtype=jnp.float32)
    out2 = jax.block_until_ready(simple_dqn_forward(x2, w1, b1, w2, b2, tile_b=128))
    ref2 = _reference(x2, w1, b1, w2, b2)
    assert out2.shape == (B2, n_actions)
    assert jnp.allclose(out2, ref2, atol=1e-5, rtol=1e-5)
    assert jnp.allclose(jnp.sum(out2, axis=1), 1.0, atol=1e-5)

    # Case 3: default tile with the >=2-step split (v7x two-core path).
    B3 = 1000
    x3 = jax.random.normal(k_x3, (B3, n_states), dtype=jnp.float32)
    out3 = jax.block_until_ready(simple_dqn_forward(x3, w1, b1, w2, b2))
    ref3 = _reference(x3, w1, b1, w2, b2)
    assert out3.shape == (B3, n_actions)
    assert jnp.allclose(out3, ref3, atol=1e-5, rtol=1e-5)
    assert jnp.allclose(jnp.sum(out3, axis=1), 1.0, atol=1e-5)

    print("KERNEL_OK")
</pallas_src>

<mosaic_0001>
module attributes {stable_mosaic.version = 11 : i64} {
  func.func @dqn_kernel(%arg0: i32, %arg1: memref<8x128xf32, #tpu.memory_space<vmem>>, %arg2: memref<32x8xf32, #tpu.memory_space<vmem>>, %arg3: memref<32x1xf32, #tpu.memory_space<vmem>>, %arg4: memref<4x32xf32, #tpu.memory_space<vmem>>, %arg5: memref<4x1xf32, #tpu.memory_space<vmem>>, %arg6: memref<4x128xf32, #tpu.memory_space<vmem>>) attributes {dimension_semantics = [#tpu.dimension_semantics<parallel>], iteration_bounds = array<i64: 1>, scalar_prefetch = 0 : i64, scratch_operands = 0 : i64, tpu.core_type = #tpu.core_type<tc>, window_params = [{transform_indices = @transform_0, window_bounds = array<i64: 8, 128>}, {pipeline_mode = #tpu.pipeline_mode<synchronous>, transform_indices = @transform_1, window_bounds = array<i64: 32, 8>}, {pipeline_mode = #tpu.pipeline_mode<synchronous>, transform_indices = @transform_2, window_bounds = array<i64: 32, 1>}, {pipeline_mode = #tpu.pipeline_mode<synchronous>, transform_indices = @transform_3, window_bounds = array<i64: 4, 32>}, {pipeline_mode = #tpu.pipeline_mode<synchronous>, transform_indices = @transform_4, window_bounds = array<i64: 4, 1>}, {transform_indices = @transform_5, window_bounds = array<i64: 4, 128>}]} {
    %c0 = arith.constant 0 : index
    %c0_0 = arith.constant 0 : index
    %0 = vector.load %arg1[%c0, %c0_0] : memref<8x128xf32, #tpu.memory_space<vmem>>, vector<8x128xf32>
    %c0_1 = arith.constant 0 : index
    %c0_2 = arith.constant 0 : index
    %1 = vector.load %arg2[%c0_1, %c0_2] : memref<32x8xf32, #tpu.memory_space<vmem>>, vector<32x8xf32>
    %cst = arith.constant dense<0.000000e+00> : vector<32x128xf32>
    %2 = tpu.matmul %1, %0, %cst {dimension_numbers = #tpu.dot_dimension_numbers<[1], [0], [0], [1], [0, 0, 1, 1], [], []>} : vector<32x8xf32>, vector<8x128xf32>, vector<32x128xf32> -> vector<32x128xf32>
    %c0_3 = arith.constant 0 : index
    %c0_4 = arith.constant 0 : index
    %3 = vector.load %arg3[%c0_3, %c0_4] : memref<32x1xf32, #tpu.memory_space<vmem>>, vector<32x1xf32>
    %4 = vector.broadcast %3 : vector<32x1xf32> to vector<32x128xf32>
    %5 = arith.addf %2, %4 : vector<32x128xf32>
    %cst_5 = arith.constant 0.000000e+00 : f32
    %6 = vector.broadcast %cst_5 : f32 to vector<32x128xf32>
    %7 = arith.maximumf %5, %6 : vector<32x128xf32>
    %c0_6 = arith.constant 0 : index
    %c0_7 = arith.constant 0 : index
    %8 = vector.load %arg4[%c0_6, %c0_7] : memref<4x32xf32, #tpu.memory_space<vmem>>, vector<4x32xf32>
    %cst_8 = arith.constant dense<0.000000e+00> : vector<4x128xf32>
    %9 = tpu.matmul %8, %7, %cst_8 {dimension_numbers = #tpu.dot_dimension_numbers<[1], [0], [0], [1], [0, 0, 1, 1], [], []>} : vector<4x32xf32>, vector<32x128xf32>, vector<4x128xf32> -> vector<4x128xf32>
    %c0_9 = arith.constant 0 : index
    %c0_10 = arith.constant 0 : index
    %10 = vector.load %arg5[%c0_9, %c0_10] : memref<4x1xf32, #tpu.memory_space<vmem>>, vector<4x1xf32>
    %11 = vector.broadcast %10 : vector<4x1xf32> to vector<4x128xf32>
    %12 = arith.addf %9, %11 : vector<4x128xf32>
    %cst_11 = arith.constant dense<0xFF800000> : vector<128xf32>
    %13 = vector.multi_reduction <maximumf>, %12, %cst_11 [0] : vector<4x128xf32> to vector<128xf32>
    %14 = vector.shape_cast %13 : vector<128xf32> to vector<1x128xf32>
    %15 = vector.broadcast %14 : vector<1x128xf32> to vector<4x128xf32>
    %16 = arith.subf %12, %15 : vector<4x128xf32>
    %17 = math.exp %16 : vector<4x128xf32>
    %cst_12 = arith.constant dense<0.000000e+00> : vector<128xf32>
    %18 = vector.multi_reduction <add>, %17, %cst_12 [0] : vector<4x128xf32> to vector<128xf32>
    %19 = vector.shape_cast %18 : vector<128xf32> to vector<1x128xf32>
    %20 = vector.broadcast %19 : vector<1x128xf32> to vector<4x128xf32>
    %21 = arith.divf %17, %20 : vector<4x128xf32>
    %c0_13 = arith.constant 0 : index
    %c0_14 = arith.constant 0 : index
    %22 = vector.load %arg6[%c0_13, %c0_14] : memref<4x128xf32, #tpu.memory_space<vmem>>, vector<4x128xf32>
    tpu.vector_store %arg6[%c0_13, %c0_14], %21 {strides = array<i32>} : memref<4x128xf32, #tpu.memory_space<vmem>>, vector<4x128xf32>,
    return
  }
  func.func @transform_0(%arg0: i32) -> (i32, i32) {
    %c0_i32 = arith.constant 0 : i32
    %c0_i32_0 = arith.constant 0 : i32
    return %c0_i32, %arg0 : i32, i32
  }
  func.func @transform_1(%arg0: i32) -> (i32, i32) {
    %c0_i32 = arith.constant 0 : i32
    %c0_i32_0 = arith.constant 0 : i32
    %c0_i32_1 = arith.constant 0 : i32
    return %c0_i32, %c0_i32_0 : i32, i32
  }
  func.func @transform_2(%arg0: i32) -> (i32, i32) {
    %c0_i32 = arith.constant 0 : i32
    %c0_i32_0 = arith.constant 0 : i32
    %c0_i32_1 = arith.constant 0 : i32
    return %c0_i32, %c0_i32_0 : i32, i32
  }
  func.func @transform_3(%arg0: i32) -> (i32, i32) {
    %c0_i32 = arith.constant 0 : i32
    %c0_i32_0 = arith.constant 0 : i32
    %c0_i32_1 = arith.constant 0 : i32
    return %c0_i32, %c0_i32_0 : i32, i32
  }
  func.func @transform_4(%arg0: i32) -> (i32, i32) {
    %c0_i32 = arith.constant 0 : i32
    %c0_i32_0 = arith.constant 0 : i32
    %c0_i32_1 = arith.constant 0 : i32
    return %c0_i32, %c0_i32_0 : i32, i32
  }
  func.func @transform_5(%arg0: i32) -> (i32, i32) {
    %c0_i32 = arith.constant 0 : i32
    %c0_i32_0 = arith.constant 0 : i32
    return %c0_i32, %arg0 : i32, i32
  }
}

</mosaic_0001>

<bundles_post_ra>
// kernel: tpu_custom_call.1
= control target key start
LH: loop header
LB: loop body
LE: loop exit
PB: predicated region body
PF: predicated region fallthrough
CT: control target
= control target key end

     0   :  { %vm50_vm0 = vcmask 64512   ;;  %v334_v5 = vmov 0   ;;  %s408_s0 = inlined_call_operand.vmem [shape: f32[8,128], index: 0, kind: input, shape index: {}]   ;;  %s409_s1 = inlined_call_operand.vmem [shape: f32[32,8], index: 1, kind: input, shape index: {}]   ;;  %s410_s2 = inlined_call_operand.vmem [shape: f32[32,1], index: 2, kind: input, shape index: {}]   ;;  %s411_s3 = inlined_call_operand.vmem [shape: f32[4,32], index: 3, kind: input, shape index: {}]   ;;  %s412_s4 = inlined_call_operand.vmem [shape: f32[4,1], index: 4, kind: input, shape index: {}]   ;;  %s413_s5 = inlined_call_operand.hbm [shape: f32[4,128], index: 5, kind: output, shape index: {}]  }
   0x1   :  { %v21_v0 = vld [vmem:[%s408_s0] sm:$0xff]  ;;  %v23_v2 = vld [vmem:[%s409_s1 + $0x8] sm:$0xff]  ;;  %v24_v3 = vld [vmem:[%s409_s1 + $0x10] sm:$0xff]  ;;  %306 = vset.pattern.permute.xlu0 %v334_v5 }
   0x2   :  { %v22_v1 = vld [vmem:[%s409_s1] sm:$0xff]  ;;  %283 = vmatprep.subr.mxu0 %v21_v0  ;;  %v29_v4 = vld [vmem:[%s410_s2 + $0x18] sm:$0xff]  ;;  %v27_v6 = vld [vmem:[%s410_s2 + $0x8] sm:$0xff] }
   0x3   :  { %285 = vmatprep.mubr.msk.f32.mxu0 %vm50_vm0, %v22_v1  ;;  %284 = vmatpush3.msra.mxu0 %v21_v0 }
   0x4   :  { %286 = vmatmul.mubr.msk.f32.vlgmr.msra.gmra.mxu0 %vm50_vm0, %v23_v2  ;;  %47 = vperm.xlu0 %306, %v29_v4  }
   0x5   :  { %10 = vsyncpa [#allocation3], 0  ;;  %288 = vmatprep.mubr.msk.f32.mxu0 %vm50_vm0, %v24_v3  ;;  %v25_v7 = vld [vmem:[%s409_s1 + $0x18] sm:$0xff]  ;;  %307 = vset.pattern.permute.xlu1 %v334_v5  ;;  %v28_v8 = vld [vmem:[%s410_s2 + $0x10] sm:$0xff]  ;;  %v335_v11 = vmov 0.0   ;;  %vm336_vm1 = vmmov 0  }
   0x6   :  { %37 = vperm.xlu1 %307, %v27_v6   ;;  %v26_v9 = vld [vmem:[%s410_s2] sm:$0xff]  ;;  %291 = vmatprep.subr.mxu1 %v335_v11  ;;  %vm159_vm2 = vcmask 261120   ;;  %vm233_vm3 = vcmask 1043456  }
   0x7   :  { %v153_v10 = vld [vmem:[%s412_s4] sm:$0xf]  ;;  %299 = vmatprep.mubr.msk.f32.mxu1 %vm336_vm1, %v335_v11 }
   0x8   :  { %289 = vmatmul.mubr.msk.f32.gmra.mxu0 %vm50_vm0, %v25_v7  ;;  %42 = vperm.xlu0 %306, %v28_v8   ;;  %v152_v28 = vld [vmem:[%s411_s3] sm:$0xf]  ;;  %s337_s3 = smov [#allocation2]  }
   0x9   :  { %s260_s4 = sshll.u32 %s337_s3, 4  ;;  %s261_s4 = int_to_ptr.vmem [resolvable:$true] %s260_s4 }
   0xa   :  { %32 = vperm.xlu1 %307, %v26_v9   ;;  %s312_s12 = scalar_lea.vmem %s261_s4, 64  ;;  %p317_p1 = scmp.lt.s32.totalorder %s261_s4, %s261_s4 }
   0xb   :  { %p313_p0 = scmp.ne.s32.totalorder %s261_s4, %s312_s12  ;;  %p318_p2 = scmp.lt.s32.totalorder %s312_s12, %s312_s12 }
   0xc   :  { %156 = vperm.xlu0 %306, %v153_v10  }
   0xd   :  { %p319_p3 = por %p318_p2, %p317_p1 }
   0xf   :  { %p320_p4 = pnand %p319_p3, %p313_p0 }
  0x7f   :  { %v48_v12 = vpop.permute.xlu0 %47 }
  0x81   :  { %v38_v13 = vpop.permute.xlu1 %37 }
  0x83   :  { %v43_v17 = vpop.permute.xlu0 %42 }
  0x85   :  { %v33_v19 = vpop.permute.xlu1 %32 }
  0x87   :  { %v157_v29 = vpop.permute.xlu0 %156 }
  0xc4   :  { %v287_v14 = vpop.f32.mrf.mxu0 }
  0xc5   :  { %v135_v21 = vadd.f32 %v287_v14, %v38_v13 }
  0xc6   :  { %v129_v15 = vpop.f32.mrf.mxu0 }
  0xc7   :  { %v130_v24 = vadd.f32 %v129_v15, %v33_v19  ;;  %v149_v26 = vmax.f32 %v135_v21, 0.0 }
  0xc8   :  { %v290_v16 = vpop.f32.mrf.mxu0 }
  0xc9   :  { %v145_v18 = vadd.f32 %v290_v16, %v48_v12  ;;  %v148_v27 = vmax.f32 %v130_v24, 0.0 }
  0xca   :  { %v139_v20 = vpop.f32.mrf.mxu0 }
  0xcb   :  { %v151_v22 = vmax.f32 %v145_v18, 0.0  ;;  %v140_v23 = vadd.f32 %v139_v20, %v43_v17 }
  0xcd   :  { %v150_v25 = vmax.f32 %v140_v23, 0.0  ;;  %292 = vmatpush3.msra.mxu1 %v151_v22 }
  0xce   :  { %293 = vmatprep.subr.mxu1 %v335_v11 }
  0xcf   :  { %294 = vmatpush3.msra.mxu1 %v150_v25 }
  0xd0   :  { %295 = vmatprep.subr.mxu1 %v335_v11 }
  0xd1   :  { %296 = vmatpush3.msra.mxu1 %v149_v26 }
  0xd2   :  { %297 = vmatprep.subr.mxu1 %v335_v11 }
  0xd3   :  { %298 = vmatpush3.msra.mxu1 %v148_v27 }
  0xd4   :  { %300 = vmatmul.mubr.msk.f32.vlgmr.msra.gmra.mxu1 %vm159_vm2, %v152_v28 }
 0x194   :  { %v229_v30 = vpop.f32.mrf.mxu1 }
 0x195   :  { %v230_v31 = vadd.f32 %v229_v30, %v157_v29 }
 0x196   :  { %v301_v32 = vpop.f32.mrf.mxu1 }
 0x197   :  { %v234_v33 = vsel %vm233_vm3, %v230_v31, -inf }
 0x198   :  { %v235_v34 = vrot.slane %v234_v33, 4 }
 0x19a   :  { %v236_v35 = vmax.f32 %v234_v33, %v235_v34 }
 0x19c   :  { %v237_v36 = vrot.slane %v236_v35, 2 }
 0x19e   :  { %v238_v37 = vmax.f32 %v236_v35, %v237_v36 }
 0x1a0   :  { %v239_v38 = vrot.slane %v238_v37, 1 }
 0x1a2   :  { %v240_v39 = vmax.f32 %v238_v37, %v239_v38 }
 0x1a4   :  { %v241_v40 = vsub.f32 %v230_v31, %v240_v39 }
 0x1a6   :  { %v242_v41 = vmul.f32 1.442695, %v241_v40 }
 0x1a8   :  { %308 = vpow2.f32 %v242_v41 }
 0x1b5   :  { %v309_v42 = vpop.eup %308 }
 0x1b6   :  { %v244_v43 = vsel %vm233_vm3, %v309_v42, 0.0 }
 0x1b7   :  { %v245_v44 = vrot.slane %v244_v43, 4 }
 0x1b9   :  { %v246_v45 = vadd.f32 %v245_v44, %v244_v43 }
 0x1bb   :  { %v247_v46 = vrot.slane %v246_v45, 2 }
 0x1bd   :  { %v248_v47 = vadd.f32 %v247_v46, %v246_v45 }
 0x1bf   :  { %v249_v48 = vrot.slane %v248_v47, 1 }
 0x1c1   :  { %v250_v49 = vadd.f32 %v249_v48, %v248_v47 }
 0x1c3   :  { %310 = vrcp.f32 %v250_v49 }
 0x1d0   :  { %v311_v50 = vpop.eup %310 }
 0x1d1   :  { %v252_v51 = vmul.f32 %v311_v50, %v309_v42 }
 0x1d3   :  { %253 = vst [vmem:[#allocation2] sm:$0xf] %v252_v51 }
 0x1d4   :  { %323 = shalt.err (!%p320_p4)
}
 0x1d5   :  { %263 = dma.vmem_to_hbm [thread:$0]  %s261_s4, 64, %s413_s5, [#allocation3]  }
 0x1d6   :  { %332 = dma.done.wait [#allocation3], 64  }
 0x1d7   :  { %333 = vsyncadd [#allocation3], 4294967232 }
 0x1d8   :  { %267 = vsyncpa [#allocation3], 1 }

</bundles_post_ra>
